<compile_context>
chip_gen: v6e
topology: v6e:2x2x1
jax: 0.10.0
libtpu: 0.0.40
codegen_flags: <defaults>
</compile_context>

<pallas_src>
import math

import jax
import jax.numpy as jnp
from jax.experimental import pallas as pl
from jax.experimental.pallas import tpu as pltpu


def _pe_add_kernel(x_ref, pe_ref, o_ref):
    # x_ref/o_ref: (TS, B*D) lane-dense tile; pe_ref: (1, B*D), broadcast over
    # sublanes by the add (cheap sublane broadcast, pure vld+vadd+vst loop).
    o_ref[...] = x_ref[...] + pe_ref[...]


def make_positional_encoding_table(d_model: int, max_len: int = 200) -> jnp.ndarray:
    """Deterministic pe buffer, shape [max_len, 1, d_model] (matches nn.Module init).

    Uses the same 0::2 / 1::2 assignment as the PyTorch module so odd d_model
    is handled identically (sin on even columns, cos on odd columns).
    """
    position = jnp.arange(max_len, dtype=jnp.float32)[:, None]           # [max_len, 1]
    div_term = jnp.exp(
        jnp.arange(0, d_model, 2, dtype=jnp.float32) * (-math.log(10000.0) / d_model)
    )                                                                    # [ceil(d/2)]
    angles = position * div_term                                         # [max_len, ceil(d/2)]
    n_even = (d_model + 1) // 2
    n_odd = d_model // 2
    pe = jnp.zeros((max_len, d_model), dtype=jnp.float32)
    pe = pe.at[:, 0::2].set(jnp.sin(angles[:, :n_even]))
    pe = pe.at[:, 1::2].set(jnp.cos(angles[:, :n_odd]))
    return pe[:, None, :]                                                # [max_len, 1, d_model]


def _pick_seq_tile(S: int, row_bytes: int, itemsize: int) -> int:
    """Largest sublane-aligned seq tile targeting ~2 MiB of x per block."""
    sublane = 16 if itemsize == 2 else 8
    if S <= sublane:
        return S                       # full extent -> satisfies block constraint
    target_rows = max(sublane, (2 * 1024 * 1024) // max(row_bytes, 1))
    ts = min(S, target_rows)
    return max(sublane, (ts // sublane) * sublane)


def positional_encoding_forward(x: jnp.ndarray, pe: jnp.ndarray) -> jnp.ndarray:
    """x: [S, B, D]; pe: [max_len, 1, D].  Returns [S, B, D]."""
    S, B, D = x.shape
    max_len = pe.shape[0]
    if B > max_len:
        raise ValueError(
            f"batch ({B}) exceeds positional table length ({max_len}); "
            "the PyTorch module would silently mis-broadcast here."
        )

    BD = B * D
    itemsize = jnp.dtype(x.dtype).itemsize
    # Lane-dense layout: flatten (B, D) -> B*D lanes (free, row-major reshape).
    x2 = x.reshape(S, BD)
    # PyTorch: self.pe[:x.size(1)] -> [B, 1, D]; flatten to one lane-dense row.
    pe_row = pe[:B, 0, :].astype(x.dtype).reshape(1, BD)

    ts = _pick_seq_tile(S, BD * itemsize, itemsize)
    grid = (pl.cdiv(S, ts),)

    out2 = pl.pallas_call(
        _pe_add_kernel,
        out_shape=jax.ShapeDtypeStruct((S, BD), x.dtype),
        grid=grid,
        in_specs=[
            pl.BlockSpec((ts, BD), lambda i: (i, 0)),
            pl.BlockSpec((1, BD), lambda i: (0, 0)),
        ],
        out_specs=pl.BlockSpec((ts, BD), lambda i: (i, 0)),
        compiler_params=pltpu.CompilerParams(dimension_semantics=("parallel",)),
    )(x2, pe_row)

    # Eval-mode dropout is identity; squeeze(-2) is a no-op on our layout.
    return out2.reshape(S, B, D)


if __name__ == "__main__":
    d_model = 32
    max_len = 200
    S, B = 8, 4

    key = jax.random.PRNGKey(0)
    x = jax.random.normal(key, (S, B, d_model), dtype=jnp.float32)

    pe = make_positional_encoding_table(d_model, max_len)

    out = positional_encoding_forward(x, pe)
    out = jax.block_until_ready(out)

    # Pure-JAX reference of the exact PyTorch semantics:
    #   x.unsqueeze(-2) + pe[:B]  -> [S, B, 1, D], then squeeze(-2).
    ref = (x[:, :, None, :] + pe[:B].astype(x.dtype)[None, :, :, :]).squeeze(-2)
    assert out.shape == (S, B, d_model)
    assert jnp.allclose(out, ref, atol=1e-6), "mismatch vs reference"

    print("KERNEL_OK")
</pallas_src>

<mosaic_0001>
module attributes {stable_mosaic.version = 11 : i64} {
  func.func @_pe_add_kernel(%arg0: i32, %arg1: memref<8x128xf32, #tpu.memory_space<vmem>>, %arg2: memref<1x128xf32, #tpu.memory_space<vmem>>, %arg3: memref<8x128xf32, #tpu.memory_space<vmem>>) attributes {dimension_semantics = [#tpu.dimension_semantics<parallel>], iteration_bounds = array<i64: 1>, scalar_prefetch = 0 : i64, scratch_operands = 0 : i64, tpu.core_type = #tpu.core_type<tc>, window_params = [{transform_indices = @transform_0, window_bounds = array<i64: 8, 128>}, {pipeline_mode = #tpu.pipeline_mode<synchronous>, transform_indices = @transform_1, window_bounds = array<i64: 1, 128>}, {transform_indices = @transform_2, window_bounds = array<i64: 8, 128>}]} {
    %c0 = arith.constant 0 : index
    %c0_0 = arith.constant 0 : index
    %0 = vector.load %arg1[%c0, %c0_0] : memref<8x128xf32, #tpu.memory_space<vmem>>, vector<8x128xf32>
    %c0_1 = arith.constant 0 : index
    %c0_2 = arith.constant 0 : index
    %1 = vector.load %arg2[%c0_1, %c0_2] : memref<1x128xf32, #tpu.memory_space<vmem>>, vector<1x128xf32>
    %2 = vector.broadcast %1 : vector<1x128xf32> to vector<8x128xf32>
    %3 = arith.addf %0, %2 : vector<8x128xf32>
    %c0_3 = arith.constant 0 : index
    %c0_4 = arith.constant 0 : index
    %4 = vector.load %arg3[%c0_3, %c0_4] : memref<8x128xf32, #tpu.memory_space<vmem>>, vector<8x128xf32>
    tpu.vector_store %arg3[%c0_3, %c0_4], %3 {strides = array<i32>} : memref<8x128xf32, #tpu.memory_space<vmem>>, vector<8x128xf32>,
    return
  }
  func.func @transform_0(%arg0: i32) -> (i32, i32) {
    %c0_i32 = arith.constant 0 : i32
    %c0_i32_0 = arith.constant 0 : i32
    return %arg0, %c0_i32 : i32, i32
  }
  func.func @transform_1(%arg0: i32) -> (i32, i32) {
    %c0_i32 = arith.constant 0 : i32
    %c0_i32_0 = arith.constant 0 : i32
    %c0_i32_1 = arith.constant 0 : i32
    return %c0_i32, %c0_i32_0 : i32, i32
  }
  func.func @transform_2(%arg0: i32) -> (i32, i32) {
    %c0_i32 = arith.constant 0 : i32
    %c0_i32_0 = arith.constant 0 : i32
    return %arg0, %c0_i32 : i32, i32
  }
}

</mosaic_0001>

<bundles_post_ra>
// kernel: tpu_custom_call.1
= control target key start
LH: loop header
LB: loop body
LE: loop exit
PB: predicated region body
PF: predicated region fallthrough
CT: control target
= control target key end

     0   :  { %7 = vsyncpa [#allocation3], 0  ;;  %s122_s0 = inlined_call_operand.hbm [shape: f32[8,128], index: 0, kind: input, shape index: {}]   ;;  %s123_s1 = inlined_call_operand.vmem [shape: f32[1,128], index: 1, kind: input, shape index: {}]   ;;  %s124_s2 = inlined_call_operand.hbm [shape: f32[8,128], index: 2, kind: output, shape index: {}]  }
   0x1   :  { %8 = vsyncpa [#allocation4], 0  ;;  %s96_s9 = smov [#allocation2]  }
   0x2   :  { %s15_s10 = sshll.u32 %s96_s9, 4  ;;  %s16_s10 = int_to_ptr.vmem [resolvable:$true] %s15_s10 }
   0x3   :  { %s60_s11 = scalar_lea.vmem %s16_s10, 128  ;;  %p65_p1 = scmp.lt.s32.totalorder %s16_s10, %s16_s10 }
   0x4   :  { %p61_p0 = scmp.ne.s32.totalorder %s16_s10, %s60_s11  ;;  %p66_p2 = scmp.lt.s32.totalorder %s60_s11, %s60_s11 }
   0x6   :  { %p67_p3 = por %p66_p2, %p65_p1 }
   0x8   :  { %p68_p4 = pnand %p67_p3, %p61_p0 }
   0xa   :  { %71 = shalt.err (!%p68_p4)
}
   0xb   :  { %18 = dma.hbm_to_vmem [thread:$0]  %s122_s0, 128, %s16_s10, [#allocation3]  }
   0xc   :  { %92 = dma.done.wait [#allocation3], 128  }
   0xd   :  { %93 = vsyncadd [#allocation3], 4294967168  ;;  %s97_s14 = smov [#allocation5]   ;;  %v24_v0 = vld [vmem:[#allocation2] sm:$0xff] }
   0xe   :  { %s40_s15 = sshll.u32 %s97_s14, 4  ;;  %v49_v1 = vld [vmem:[%s123_s1] ss:$0 sm:$0xff]  ;;  %s41_s15 = int_to_ptr.vmem [resolvable:$true] %s40_s15 }
   0xf   :  { %v32_v2 = vadd.f32 %v49_v1, %v24_v0  ;;  %s72_s18 = scalar_lea.vmem %s41_s15, 128  ;;  %p77_p6 = scmp.lt.s32.totalorder %s41_s15, %s41_s15 }
  0x10   :  { %p73_p5 = scmp.ne.s32.totalorder %s41_s15, %s72_s18  ;;  %p78_p7 = scmp.lt.s32.totalorder %s72_s18, %s72_s18 }
  0x11   :  { %33 = vst [vmem:[#allocation5] sm:$0xff] %v32_v2 }
  0x12   :  { %p79_p8 = por %p78_p7, %p77_p6 }
  0x14   :  { %p80_p9 = pnand %p79_p8, %p73_p5 }
  0x16   :  { %83 = shalt.err (!%p80_p9)
}
  0x17   :  { %43 = dma.vmem_to_hbm [thread:$0]  %s41_s15, 128, %s124_s2, [#allocation4]  }
  0x18   :  { %94 = dma.done.wait [#allocation4], 128  }
  0x19   :  { %95 = vsyncadd [#allocation4], 4294967168 }
  0x1a   :  { %47 = vsyncpa [#allocation3], 1 }
  0x1b   :  { %48 = vsyncpa [#allocation4], 1 }

</bundles_post_ra>
